<compile_context>
chip_gen: v7x
topology: tpu7x:2x2x1
jax: 0.10.0
libtpu: 0.0.40
codegen_flags: <defaults>
</compile_context>

<pallas_src>
import math

import jax
import jax.numpy as jnp
from jax.experimental import pallas as pl
from jax.experimental.pallas import tpu as pltpu

EPS = 1e-6


def _round_up(x, m):
    return ((x + m - 1) // m) * m


# ---------------------------------------------------------------------------
# Kernels
# ---------------------------------------------------------------------------
def residual_connection_kernel(x_ref, w_ref, b_ref, o_ref):
    """Small/medium-D path: whole (D, D) bf16 weight resident in VMEM.

    x_ref / o_ref: (TS, D) row tile of the flattened (B*S, D) activations.
    LayerNorm's alpha/beta are folded into w/b on the host, so the kernel only
    computes (x - mean) * inv_std before the matmul.
    """
    x = x_ref[...].astype(jnp.float32)                        # (TS, D)
    d = x.shape[-1]

    # --- LayerNorm stats in one pass (sum & sum-of-squares) ----------------
    s = jnp.sum(x, axis=-1, keepdims=True)                    # (TS, 1)
    sq = jnp.sum(x * x, axis=-1, keepdims=True)               # (TS, 1)
    mean = s * (1.0 / d)
    var = jnp.maximum((sq - s * mean) * (1.0 / (d - 1)), 0.0)  # unbiased (torch.std)
    inv = pl.reciprocal(jnp.sqrt(var) + EPS, approx=True)     # EUP, off the VALU path
    y = (x - mean) * inv                                      # alpha/beta folded into w/b

    # --- sublayer: Linear(D, D) on the MXU (bf16 in, f32 accumulate) -------
    sub = jnp.dot(y.astype(jnp.bfloat16), w_ref[...],
                  preferred_element_type=jnp.float32) + b_ref[...]

    # --- dropout (inference mode => identity) + residual add ---------------
    o_ref[...] = (x + sub).astype(o_ref.dtype)


def residual_connection_kernel_ntiled(x_ref, xcol_ref, w_ref, b_ref, o_ref, y_scr):
    """Large-D path: weight streamed in (D, TN) column tiles along grid axis j.

    LayerNorm'd activations are computed once per row tile (j == 0) into a
    resident bf16 VMEM scratch and reused for every weight column tile, so the
    VPU/EUP work is not replicated across the N axis.
    """
    j = pl.program_id(1)

    @pl.when(j == 0)
    def _():
        x = x_ref[...].astype(jnp.float32)                    # (TS, D)
        d = x.shape[-1]
        s = jnp.sum(x, axis=-1, keepdims=True)
        sq = jnp.sum(x * x, axis=-1, keepdims=True)
        mean = s * (1.0 / d)
        var = jnp.maximum((sq - s * mean) * (1.0 / (d - 1)), 0.0)
        inv = pl.reciprocal(jnp.sqrt(var) + EPS, approx=True)
        y_scr[...] = ((x - mean) * inv).astype(jnp.bfloat16)

    sub = jnp.dot(y_scr[...], w_ref[...],
                  preferred_element_type=jnp.float32) + b_ref[...]
    o_ref[...] = (xcol_ref[...].astype(jnp.float32) + sub).astype(o_ref.dtype)


# ---------------------------------------------------------------------------
# Wrapper
# ---------------------------------------------------------------------------
def _pick_row_tile(rows, d):
    """MXU-friendly row tile, adapted to D (VMEM pressure) and R (occupancy)."""
    if d <= 1024:
        target = 1024
    elif d <= 2048:
        target = 512
    else:
        target = 256
    if rows <= 8:
        return rows
    if rows <= 2 * target:
        # Split into at least two row tiles so the "parallel" grid axis can be
        # sharded across both TensorCores on v7x (negligible cost on v5e/v6e).
        half = -(-rows // 2)
        return min(_round_up(half, 8), _round_up(rows, 8))
    # Prefer an MXU-M-aligned tile that divides R exactly (unmasked stores).
    for align in (256, 128, 8):
        ts = (target // align) * align
        while ts >= align:
            if rows % ts == 0:
                return ts
            ts -= align
    return target


def _vmem_cap_bytes():
    try:
        return int(pltpu.get_tpu_info().vmem_capacity_bytes)
    except Exception:
        return 64 << 20  # conservative fallback: v7x-sized (64 MiB / TC) VMEM


def residual_connection(x, w, b, alpha, beta, *, weight_tile_n=None):
    """forward(x) = x + dropout(Linear(LayerNorm(x))), dropout in eval mode.

    x: (B, S, D); w: (D, D); b: (D,) or (1, D); alpha/beta: (1,) LayerNorm params.
    D must be a multiple of 128 (lane-dense output stores).
    weight_tile_n: force the weight-streaming (N-tiled) path with this column
      tile (multiple of 128 dividing D); None => chosen automatically.
    """
    B, S, D = x.shape
    if D % 128 != 0:
        # TODO(synk): pad D to a multiple of 128 (masked LN stats) for arbitrary dims.
        raise ValueError(f"D={D} must be a multiple of 128 for this kernel")
    R = B * S
    x2 = x.reshape(R, D)
    itemsize = x2.dtype.itemsize

    # --- fold LayerNorm's scalar alpha/beta into the Linear weight/bias ----
    #   (alpha*(x-mean)*inv + beta) @ W + b
    #     == ((x-mean)*inv) @ (alpha*W) + (b + beta * colsum(W))
    alpha_s = jnp.asarray(alpha, jnp.float32).reshape(())
    beta_s = jnp.asarray(beta, jnp.float32).reshape(())
    w32 = w.astype(jnp.float32)
    w_bf16 = (alpha_s * w32).astype(jnp.bfloat16)        # MXU-native, half footprint
    b_f32 = (jnp.reshape(b, (1, D)).astype(jnp.float32)
             + beta_s * jnp.sum(w32, axis=0, keepdims=True))

    ts = _pick_row_tile(R, D)
    budget = _vmem_cap_bytes() - (8 << 20)               # per-generation headroom

    # Stream the weight in column tiles when a single resident copy would eat
    # too much of this generation's VMEM (e.g. D>=4096 on v7x).
    use_ntiled = weight_tile_n is not None or (2 * D * D > budget // 4)

    if not use_ntiled:
        vmem_bytes = (
            2 * ts * D * itemsize       # double-buffered input tiles
            + 2 * ts * D * itemsize     # double-buffered output tiles
            + 2 * D * D + 4 * D         # single resident bf16 weight + f32 bias
            + 3 * ts * D * 4            # in-kernel f32 temporaries (x, y, sub)
        )
        out = pl.pallas_call(
            residual_connection_kernel,
            out_shape=jax.ShapeDtypeStruct((R, D), x.dtype),
            grid=(pl.cdiv(R, ts),),
            in_specs=[
                # (TS, D) row tile of the flattened activations
                pl.BlockSpec((ts, D), lambda i: (i, 0)),
                # Whole-array VMEM placement => one resident copy of the weight
                # and bias (no per-step re-DMA / pipeline double-buffering).
                pl.BlockSpec(memory_space=pltpu.MemorySpace.VMEM),   # w (bf16)
                pl.BlockSpec(memory_space=pltpu.MemorySpace.VMEM),   # b (f32)
            ],
            out_specs=pl.BlockSpec((ts, D), lambda i: (i, 0)),
            compiler_params=pltpu.CompilerParams(
                dimension_semantics=("parallel",),
                vmem_limit_bytes=int(min(max(vmem_bytes, 16 << 20), budget)),
            ),
        )(x2, w_bf16, b_f32)
        return out.reshape(B, S, D)

    # ---- weight-streaming (N-tiled) path for large D -----------------------
    if weight_tile_n is not None:
        tn = int(weight_tile_n)
    else:
        tn = next(t for t in (512, 256, 128) if D % t == 0)
    if tn % 128 != 0 or D % tn != 0:
        raise ValueError(f"weight_tile_n={tn} must be a multiple of 128 dividing D={D}")

    vmem_bytes = (
        2 * ts * D * itemsize           # full-width x tiles (LN input, resident per i)
        + 2 * ts * tn * itemsize        # residual x column tiles
        + 2 * D * tn * 2                # streamed bf16 weight tiles (double-buffered)
        + 2 * tn * 4                    # bias tiles
        + 2 * ts * tn * itemsize        # output tiles
        + ts * D * 2                    # resident bf16 y scratch
        + 3 * ts * D * 4                # LN f32 temporaries (only at j == 0)
    )
    out = pl.pallas_call(
        residual_connection_kernel_ntiled,
        out_shape=jax.ShapeDtypeStruct((R, D), x.dtype),
        grid=(pl.cdiv(R, ts), D // tn),
        in_specs=[
            pl.BlockSpec((ts, D), lambda i, j: (i, 0)),    # x (constant over j)
            pl.BlockSpec((ts, tn), lambda i, j: (i, j)),   # x column for residual add
            pl.BlockSpec((D, tn), lambda i, j: (0, j)),    # streamed weight tile
            pl.BlockSpec((1, tn), lambda i, j: (0, j)),    # bias tile
        ],
        out_specs=pl.BlockSpec((ts, tn), lambda i, j: (i, j)),
        scratch_shapes=[pltpu.VMEM((ts, D), jnp.bfloat16)],
        compiler_params=pltpu.CompilerParams(
            dimension_semantics=("parallel", "arbitrary"),
            vmem_limit_bytes=int(min(max(vmem_bytes, 16 << 20), budget)),
        ),
    )(x2, x2, w_bf16, b_f32)
    return out.reshape(B, S, D)


# ---------------------------------------------------------------------------
# Pure-JAX reference (module semantics; bf16 matmul like the kernel)
# ---------------------------------------------------------------------------
def residual_connection_ref(x, w, b, alpha, beta):
    xf = x.astype(jnp.float32)
    d = xf.shape[-1]
    mean = jnp.mean(xf, axis=-1, keepdims=True)
    var = jnp.sum((xf - mean) ** 2, axis=-1, keepdims=True) / (d - 1)
    std = jnp.sqrt(var)
    y = alpha.reshape(()) * (xf - mean) / (std + EPS) + beta.reshape(())
    sub = jnp.dot(y.astype(jnp.bfloat16), w.astype(jnp.bfloat16),
                  preferred_element_type=jnp.float32) + jnp.reshape(b, (1, -1)).astype(jnp.float32)
    return (xf + sub).astype(x.dtype)


if __name__ == "__main__":
    key = jax.random.PRNGKey(0)
    kx1, kw1, kb1, kx2, kw2, kb2 = jax.random.split(key, 6)

    # Non-trivial LayerNorm params so the alpha/beta folding is exercised.
    alpha = jnp.full((1,), 1.25, dtype=jnp.float32)
    beta = jnp.full((1,), -0.3, dtype=jnp.float32)

    # --- Test 1: resident-weight path (small D) -----------------------------
    B, S, D = 2, 8, 128
    x = jax.random.normal(kx1, (B, S, D), dtype=jnp.float32)
    w = jax.random.normal(kw1, (D, D), dtype=jnp.float32) / math.sqrt(D)
    b = jax.random.normal(kb1, (1, D), dtype=jnp.float32) * 0.01

    out = jax.block_until_ready(residual_connection(x, w, b, alpha, beta))
    ref = residual_connection_ref(x, w, b, alpha, beta)
    assert out.shape == x.shape and out.dtype == x.dtype
    err = float(jnp.max(jnp.abs(out - ref)))
    assert jnp.allclose(out, ref, atol=2e-2, rtol=2e-2), f"resident path mismatch (max err {err})"

    # --- Test 2: weight-streaming (N-tiled) path, forced at a small shape ---
    D2 = 256
    x2 = jax.random.normal(kx2, (B, S, D2), dtype=jnp.float32)
    w2 = jax.random.normal(kw2, (D2, D2), dtype=jnp.float32) / math.sqrt(D2)
    b2 = jax.random.normal(kb2, (1, D2), dtype=jnp.float32) * 0.01

    out2 = jax.block_until_ready(
        residual_connection(x2, w2, b2, alpha, beta, weight_tile_n=128))
    ref2 = residual_connection_ref(x2, w2, b2, alpha, beta)
    assert out2.shape == x2.shape and out2.dtype == x2.dtype
    err2 = float(jnp.max(jnp.abs(out2 - ref2)))
    assert jnp.allclose(out2, ref2, atol=2e-2, rtol=2e-2), f"streaming path mismatch (max err {err2})"

    print("KERNEL_OK")
</pallas_src>

<mosaic_0001>
module attributes {stable_mosaic.version = 11 : i64} {
  func.func @residual_connection_kernel(%arg0: i32, %arg1: memref<8x128xf32, #tpu.memory_space<vmem>>, %arg2: memref<128x128xbf16, #tpu.memory_space<vmem>>, %arg3: memref<1x128xf32, #tpu.memory_space<vmem>>, %arg4: memref<8x128xf32, #tpu.memory_space<vmem>>) attributes {dimension_semantics = [#tpu.dimension_semantics<parallel>], iteration_bounds = array<i64: 2>, scalar_prefetch = 0 : i64, scratch_operands = 0 : i64, tpu.core_type = #tpu.core_type<tc>, window_params = [{transform_indices = @transform_0, window_bounds = array<i64: 8, 128>}, {pipeline_mode = #tpu.pipeline_mode<synchronous>, transform_indices = @transform_1, window_bounds = array<i64: 128, 128>}, {pipeline_mode = #tpu.pipeline_mode<synchronous>, transform_indices = @transform_2, window_bounds = array<i64: 1, 128>}, {transform_indices = @transform_3, window_bounds = array<i64: 8, 128>}]} {
    %c0 = arith.constant 0 : index
    %c0_0 = arith.constant 0 : index
    %0 = vector.load %arg1[%c0, %c0_0] : memref<8x128xf32, #tpu.memory_space<vmem>>, vector<8x128xf32>
    %cst = arith.constant dense<0.000000e+00> : vector<8xf32>
    %1 = vector.multi_reduction <add>, %0, %cst [1] : vector<8x128xf32> to vector<8xf32>
    %2 = vector.shape_cast %1 : vector<8xf32> to vector<8x1xf32>
    %3 = arith.mulf %0, %0 : vector<8x128xf32>
    %cst_1 = arith.constant dense<0.000000e+00> : vector<8xf32>
    %4 = vector.multi_reduction <add>, %3, %cst_1 [1] : vector<8x128xf32> to vector<8xf32>
    %5 = vector.shape_cast %4 : vector<8xf32> to vector<8x1xf32>
    %cst_2 = arith.constant 7.812500e-03 : f32
    %6 = vector.broadcast %cst_2 : f32 to vector<8x1xf32>
    %7 = arith.mulf %2, %6 : vector<8x1xf32>
    %8 = arith.mulf %2, %7 : vector<8x1xf32>
    %9 = arith.subf %5, %8 : vector<8x1xf32>
    %cst_3 = arith.constant 0.00787401571 : f32
    %10 = vector.broadcast %cst_3 : f32 to vector<8x1xf32>
    %11 = arith.mulf %9, %10 : vector<8x1xf32>
    %cst_4 = arith.constant 0.000000e+00 : f32
    %12 = vector.broadcast %cst_4 : f32 to vector<8x1xf32>
    %13 = arith.maximumf %11, %12 : vector<8x1xf32>
    %14 = math.sqrt %13 : vector<8x1xf32>
    %cst_5 = arith.constant 9.99999997E-7 : f32
    %15 = vector.broadcast %cst_5 : f32 to vector<8x1xf32>
    %16 = arith.addf %14, %15 : vector<8x1xf32>
    %17 = tpu.reciprocal %16 {approx = true} : vector<8x1xf32> -> vector<8x1xf32>
    %18 = vector.broadcast %7 : vector<8x1xf32> to vector<8x128xf32>
    %19 = arith.subf %0, %18 : vector<8x128xf32>
    %20 = vector.broadcast %17 : vector<8x1xf32> to vector<8x128xf32>
    %21 = arith.mulf %19, %20 : vector<8x128xf32>
    %22 = arith.truncf %21 : vector<8x128xf32> to vector<8x128xbf16>
    %c0_6 = arith.constant 0 : index
    %c0_7 = arith.constant 0 : index
    %23 = vector.load %arg2[%c0_6, %c0_7] : memref<128x128xbf16, #tpu.memory_space<vmem>>, vector<128x128xbf16>
    %cst_8 = arith.constant dense<0.000000e+00> : vector<8x128xf32>
    %24 = tpu.matmul %22, %23, %cst_8 {dimension_numbers = #tpu.dot_dimension_numbers<[1], [0], [0], [1], [0, 0, 1, 1], [], []>} : vector<8x128xbf16>, vector<128x128xbf16>, vector<8x128xf32> -> vector<8x128xf32>
    %c0_9 = arith.constant 0 : index
    %c0_10 = arith.constant 0 : index
    %25 = vector.load %arg3[%c0_9, %c0_10] : memref<1x128xf32, #tpu.memory_space<vmem>>, vector<1x128xf32>
    %26 = vector.broadcast %25 : vector<1x128xf32> to vector<8x128xf32>
    %27 = arith.addf %24, %26 : vector<8x128xf32>
    %28 = arith.addf %0, %27 : vector<8x128xf32>
    %c0_11 = arith.constant 0 : index
    %c0_12 = arith.constant 0 : index
    %29 = vector.load %arg4[%c0_11, %c0_12] : memref<8x128xf32, #tpu.memory_space<vmem>>, vector<8x128xf32>
    tpu.vector_store %arg4[%c0_11, %c0_12], %28 {strides = array<i32>} : memref<8x128xf32, #tpu.memory_space<vmem>>, vector<8x128xf32>,
    return
  }
  func.func @transform_0(%arg0: i32) -> (i32, i32) {
    %c0_i32 = arith.constant 0 : i32
    %c0_i32_0 = arith.constant 0 : i32
    return %arg0, %c0_i32 : i32, i32
  }
  func.func @transform_1(%arg0: i32) -> (i32, i32) {
    %c0_i32 = arith.constant 0 : i32
    %c0_i32_0 = arith.constant 0 : i32
    %c0_i32_1 = arith.constant 0 : i32
    return %c0_i32, %c0_i32_0 : i32, i32
  }
  func.func @transform_2(%arg0: i32) -> (i32, i32) {
    %c0_i32 = arith.constant 0 : i32
    %c0_i32_0 = arith.constant 0 : i32
    %c0_i32_1 = arith.constant 0 : i32
    return %c0_i32, %c0_i32_0 : i32, i32
  }
  func.func @transform_3(%arg0: i32) -> (i32, i32) {
    %c0_i32 = arith.constant 0 : i32
    %c0_i32_0 = arith.constant 0 : i32
    return %arg0, %c0_i32 : i32, i32
  }
}

</mosaic_0001>

<bundles_post_ra>
// kernel: tpu_custom_call.1
= control target key start
LH: loop header
LB: loop body
LE: loop exit
PB: predicated region body
PF: predicated region fallthrough
CT: control target
= control target key end

     0   :  { %8 = vsyncpa [#allocation3], 0  ;;  %s917_s0 = inlined_call_operand.hbm [shape: f32[16,128], index: 0, kind: input, shape index: {}]   ;;  %s918_s1 = inlined_call_operand.hbm [shape: bf16[128,128], index: 1, kind: input, shape index: {}]   ;;  %s919_s2 = inlined_call_operand.vmem [shape: f32[1,128], index: 2, kind: input, shape index: {}]   ;;  %s920_s3 = inlined_call_operand.hbm [shape: f32[16,128], index: 3, kind: output, shape index: {}]  }
   0x1   :  { %10 = vsyncpa [#allocation3 + $0x1], 0 }
   0x2   :  { %11 = vsyncpa [#allocation6], 0 }
   0x3   :  { %12 = vsyncpa [#allocation4], 0 }
   0x4   :  { %14 = vsyncpa [#allocation4 + $0x1], 0  ;;  %s714_s12 = smov 0   ;;  %s716_s13 = smov 0  }
   0x5   :  { %s718_s14 = smov 0   ;;  %s720_s15 = smov 0  }
   0x6 LB: > { %s735_s16 = sadd.s32 4294967295, %s685_s15   ;;  %s432_s17 = sadd.s32 4294967294, %s685_s15   ;;  %s685_s15 = sphi %s720_s15, %s940_s15   ;;  %s681_s14 = sphi %s718_s14, %s939_s14   ;;  %s677_s13 = sphi %s716_s13, %s938_s13   ;;  %s673_s12 = sphi %s714_s12, %s937_s12  }
   0x7   : > { %p40_p0 = scmp.ne.s32.totalorder %s677_s13, %s673_s12  ;;  %p921_p1 = scmp.eq.s32.totalorder %s735_s16, 0 }
   0x8   : > { %p112_p3 = scmp.eq.s32.totalorder %s432_s17, 1  ;;  %p433_p5 = scmp.ge.s32.totalorder %s685_s15, 1 }
   0x9   : > { %p744_p4 = por %p921_p1, %p40_p0  ;;  %p119_p7 = scmp.lt.s32.totalorder %s685_s15, 3 }
   0xa   : > { %p749_p6 = por %p112_p3, %p40_p0  ;;  %s687_s21 = smov [#allocation5]  }
   0xb   : > { %s924_s18 = scalar_select %p744_p4, 1, 0 }
   0xc   : > { %s925_s19 = scalar_select %p749_p6, 1, 0 }
   0xd   : > { %p754_p8 = pnand %p433_p5, %p119_p7  ;;  %s131_s22 = sshll.u32 %s687_s21, 4  ;;  %s758_s22 = int_to_ptr.vmem [resolvable:$true] %s131_s22 }
   0xe   : > { %s770_s24 = sadd.s32 1, %s685_s15   ;;  %s27_s25 = sadd.s32 1, %s681_s14 }
   0xf   : > { %s926_s20 = scalar_select %p754_p8, 1, 0 }
  0x10   : > { %p492_p9 = pneg %p754_p8  ;;  %s24_s26 = ssub.s32 %s685_s15, %s770_s24 }
  0x11   : > { %s557_s29 = scalar_lea.hbm %s918_s1, 1024 }
  0x12   : > { %p765_p11 = pnand %p492_p9, %p921_p1  ;;  %p558_p12 = scmp.ne.s32.totalorder %s918_s1, %s557_s29 }
  0x13   : > { %p564_p5 = scmp.lt.u32.totalorder %s557_s29, %s918_s1 }
  0x14   : > { %p559_p13 = pneg %p765_p11 }
  0x16   : > { %p560_p0 = pnand %p559_p13, %p558_p12 }
  0x18   : > { %p561_p3 = pneg %p560_p0 }
  0x1a   : > { %p566_p7 = pnand %p564_p5, %p561_p3 }
  0x1c   : > { %569 = shalt.err (!%p566_p7)
}
  0x1d   : > { %s570_s7 = scalar_lea.vmem %s758_s22, 1024  ;;  %p578_p2 = scmp.lt.s32.totalorder %s758_s22, %s758_s22 }
  0x1e   : > { %p571_p9 = scmp.ne.s32.totalorder %s758_s22, %s570_s7  ;;  %p579_p6 = scmp.lt.s32.totalorder %s570_s7, %s570_s7 }
  0x20   : > { %p573_p10 = pnand %p571_p9, %p559_p13  ;;  %p580_p4 = por %p579_p6, %p578_p2 }
  0x22   : > { %p574_p1 = pneg %p573_p10 }
  0x24   : > { %p581_p8 = pnand %p580_p4, %p574_p1 }
  0x26   : > { %584 = shalt.err (!%p581_p8)
}
  0x27   : > { %s688_s8 = smov 64   ;;  %s689_s9 = smov 4  }
  0x28   : > { %495 = dma.hbm_to_vmem [thread:$0]  (!%p765_p11), %s918_s1, 1024, %s758_s22, [#allocation6], %s688_s8, %s688_s8, %s689_s9  }
  0x29   : > { %p25_p2 = scmp.eq.s32.totalorder %s24_s26, 0  ;;  %p34_p1 = scmp.ne.s32.totalorder %s681_s14, %s677_s13 }
  0x2a   : > { %p35_p4 = scmp.eq.s32.totalorder %s685_s15, 0  ;;  %p505_p6 = scmp.lt.s32.totalorder %s685_s15, 2 }
  0x2b   : > { %s801_s17 = scalar_select %p25_p2, %s681_s14, %s27_s25  }
  0x2c   : > { %p36_p8 = por %p35_p4, %p34_p1  ;;  %p928_p10 = scmp.eq.s32.totalorder %s735_s16, 1 }
  0x2d   : > { %s148_s27 = sand.u32 1, %s681_s14   ;;  %s437_s28 = sshll.u32 %s685_s15, 7 }
  0x2e   : > { %p805_p12 = por %p928_p10, %p34_p1  ;;  %s436_s29 = sshll.u32 %s148_s27, 3 }
  0x2f   : > { %s814_s4 = scalar_lea.hbm %s917_s0, %s437_s28  ;;  %s152_s22 = scalar_lea.vmem [#allocation2], %s436_s29 }
  0x30   : > { %s159_s25 = sshll.u32 %s152_s22, 4  ;;  %p816_p11 = pnand %p505_p6, %p36_p8  ;;  %s820_s25 = int_to_ptr.vmem [resolvable:$true] %s159_s25 }
  0x31   : > { %s149_s5 = scalar_lea.sflag [#allocation3], %s148_s27  ;;  %s585_s6 = scalar_lea.hbm %s814_s4, 128 }
  0x32   : > { %p586_p13 = scmp.ne.s32.totalorder %s814_s4, %s585_s6  ;;  %p587_p0 = pneg %p816_p11 }
  0x33   : > { %s590_s9 = scalar_lea.hbm %s917_s0, 256  ;;  %p591_p7 = scmp.lt.u32.totalorder %s814_s4, %s917_s0 }
  0x34   : > { %p588_p3 = pnand %p587_p0, %p586_p13  ;;  %p592_p9 = scmp.lt.u32.totalorder %s590_s9, %s585_s6 }
  0x35   : > { %p594_p1 = scmp.lt.u32.totalorder %s585_s6, %s814_s4 }
  0x36   : > { %p589_p5 = pneg %p588_p3  ;;  %p593_p2 = por %p592_p9, %p591_p7 }
  0x38   : > { %p595_p4 = por %p594_p1, %p593_p2 }
  0x3a   : > { %p596_p6 = pnand %p595_p4, %p589_p5 }
  0x3c   : > { %599 = shalt.err (!%p596_p6)
}
  0x3d   : > { %s600_s27 = scalar_lea.vmem %s820_s25, 128  ;;  %s690_s28 = smov [#allocation2]  }
  0x3e   : > { %p601_p8 = scmp.ne.s32.totalorder %s820_s25, %s600_s27  ;;  %s605_s29 = sshll.u32 %s690_s28, 4  ;;  %s606_s29 = int_to_ptr.vmem [resolvable:$false] %s605_s29 }
  0x3f   : > { %s607_s23 = scalar_lea.vmem %s606_s29, 256  ;;  %p608_p3 = scmp.lt.s32.totalorder %s820_s25, %s606_s29 }
  0x40   : > { %p603_p10 = pnand %p601_p8, %p587_p0  ;;  %p609_p7 = scmp.lt.s32.totalorder %s607_s23, %s600_s27 }
  0x42   : > { %p604_p13 = pneg %p603_p10  ;;  %p610_p9 = por %p609_p7, %p608_p3 }
  0x44   : > { %p611_p2 = pnand %p610_p9, %p604_p13 }
  0x46   : > { %614 = shalt.err (!%p611_p2)
}
  0x47   : > { %499 = dma.hbm_to_vmem [thread:$0]  (!%p816_p11), %s814_s4, 128, %s820_s25, %s149_s5  }
  0x48   : > { %p931_p5 = scmp.ne.s32.totalorder %s926_s20, 0 }
  0x49   : > { %s850_s30 = sand.u32 (!%p931_p5), 1, %s677_s13   ;;  %p932_p0 = scmp.ne.s32.totalorder (!%p931_p5), %s924_s18, 0 }
  0x4a   : > { %168 = sbr.rel (%p931_p5) target bundleno = 500 (0x1f4), region = 32  ;;  %s439_s22 = sshll.u32 (!%p931_p5), %s850_s30, 3 }
  0x4b   : > { %s171_s6 = scalar_lea.sflag (!%p931_p5), [#allocation3], %s850_s30  ;;  %s174_s7 = scalar_lea.vmem (!%p931_p5), [#allocation2], %s439_s22 }
  0x51   : > { %660 = dma.done.wait (%p932_p0), %s171_s6, 128  }
  0x52   : > { %662 = vsyncadd (%p932_p0), %s171_s6, 4294967168  ;;  %p933_p11 = scmp.eq.s32.totalorder %s735_s16, 0 }
  0x54   : > { %664 = dma.done.wait (%p933_p11), [#allocation6], 1024   ;;  %p934_p1 = pmov %p933_p11 }
  0x55   : > { %v202_v0 = vld [vmem:[%s174_s7] sm:$0xff]  ;;  %v545_v2 = vld [vmem:[#allocation5] sm:$0xff]   ;;  %v691_v3 = vmov 0.0   ;;  %v546_v4 = vld [vmem:[#allocation5 + $0x8] sm:$0xff]   ;;  %vm692_vm0 = vmmov 0   ;;  %s452_s4 = sshll.u32 %s735_s16, 7 }
  0x56   : > { %666 = vsyncadd (%p934_p1), [#allocation6], 4294966272  ;;  %203 = vadd.xlane.f32.xlu0 %v202_v0  ;;  %v205_v1 = vmul.f32 %v202_v0, %v202_v0  ;;  %464 = vmatprep.subr.bf16.mxu0 %v691_v3  ;;  %v547_v5 = vld [vmem:[#allocation5 + $0x10] sm:$0xff]   ;;  %v548_v6 = vld [vmem:[#allocation5 + $0x18] sm:$0xff]   ;;  %s200_s25 = scalar_lea.vmem [#allocation7], %s439_s22  ;;  %s873_s9 = scalar_lea.hbm %s920_s3, %s452_s4 }
  0x57   : > { %465 = vmatpush3.bf16.msra.mxu0 %v545_v2  ;;  %480 = vmatprep.mubr.msk.bf16.mxu0 %vm692_vm0, %v691_v3  ;;  %v549_v7 = vld [vmem:[#allocation5 + $0x20] sm:$0xff]   ;;  %v550_v8 = vld [vmem:[#allocation5 + $0x28] sm:$0xff]   ;;  %v551_v9 = vld [vmem:[#allocation5 + $0x30] sm:$0xff]   ;;  %s352_s26 = sshll.u32 %s200_s25, 4  ;;  %s339_s16 = scalar_lea.sflag [#allocation4], %s850_s30  ;;  %s875_s26 = int_to_ptr.vmem [resolvable:$true] %s352_s26 }
  0x58   : > { %466 = vmatprep.subr.bf16.mxu0 %v691_v3  ;;  %v552_v10 = vld [vmem:[#allocation5 + $0x38] sm:$0xff]   ;;  %v442_v28 = vld [vmem:[%s919_s2] ss:$0 sm:$0xff]  ;;  %s615_s10 = scalar_lea.vmem %s875_s26, 128  ;;  %s693_s11 = smov [#allocation7]  }
  0x59   : > { %p616_p4 = scmp.ne.s32.totalorder %s875_s26, %s615_s10  ;;  %s619_s27 = sshll.u32 %s693_s11, 4  ;;  %s620_s27 = int_to_ptr.vmem [resolvable:$false] %s619_s27 }
  0x5a   : > { %206 = vadd.xlane.f32.xlu0 %v205_v1  ;;  %s621_s28 = scalar_lea.vmem %s620_s27, 256  ;;  %p622_p10 = scmp.lt.s32.totalorder %s875_s26, %s620_s27 }
  0x5b   : > { %467 = vmatpush3.bf16.msra.mxu0 %v546_v4  ;;  %p617_p6 = pnand %p616_p4, %p805_p12  ;;  %p623_p13 = scmp.lt.s32.totalorder %s621_s28, %s615_s10 }
  0x5c   : > { %468 = vmatprep.subr.bf16.mxu0 %v691_v3 }
  0x5d   : > { %p618_p8 = pneg %p617_p6  ;;  %p624_p3 = por %p623_p13, %p622_p10 }
  0x5f   : > { %469 = vmatpush3.bf16.msra.mxu0 %v547_v5  ;;  %p625_p7 = pnand %p624_p3, %p618_p8 }
  0x60   : > { %470 = vmatprep.subr.bf16.mxu0 %v691_v3 }
  0x63   : > { %471 = vmatpush3.bf16.msra.mxu0 %v548_v6 }
  0x64   : > { %472 = vmatprep.subr.bf16.mxu0 %v691_v3 }
  0x67   : > { %473 = vmatpush3.bf16.msra.mxu0 %v549_v7 }
  0x68   : > { %474 = vmatprep.subr.bf16.mxu0 %v691_v3 }
  0x6b   : > { %475 = vmatpush3.bf16.msra.mxu0 %v550_v8 }
  0x6c   : > { %476 = vmatprep.subr.bf16.mxu0 %v691_v3 }
  0x6f   : > { %477 = vmatpush3.bf16.msra.mxu0 %v551_v9 }
  0x70   : > { %478 = vmatprep.subr.bf16.mxu0 %v691_v3 }
  0x73   : > { %479 = vmatpush3.bf16.msra.mxu0 %v552_v10 }
  0xe3   : > { %v204_v11 = vpop.xlane.xlu0 %203 }
  0xe4   : > { %v208_v12 = vmul.f32 0.0078125, %v204_v11 }
  0xe6   : > { %v209_v13 = vmul.f32 %v208_v12, %v204_v11  ;;  %v222_v24 = vsub.f32 %v202_v0, %v208_v12 }
  0xe7   : > { %v207_v14 = vpop.xlane.xlu0 %206 }
  0xe8   : > { %v210_v15 = vsub.f32 %v207_v14, %v209_v13 }
  0xea   : > { %v211_v16 = vmul.f32 0.007874016, %v210_v15 }
  0xec   : > { %v212_v17 = vmax.f32 %v211_v16, 0.0 }
  0xee   : > { %553 = vrsqrt.f32 %v212_v17  ;;  %vm215_vm1 = vcmp.eq.f32.partialorder %v212_v17, inf  ;;  %v218_v20 = vand.u32 2147483648, %v212_v17  ;;  %vm217_vm2 = vcmp.eq.f32.partialorder %v212_v17, 0.0 }
  0xf8   : > { %v554_v18 = vpop.eup %553 }
  0xf9   : > { %v214_v19 = vmul.f32 %v554_v18, %v212_v17 }
  0xfb   : > { %v216_v21 = vsel %vm215_vm1, %v212_v17, %v214_v19 }
  0xfc   : > { %v219_v22 = vsel %vm217_vm2, %v218_v20, %v216_v21 }
  0xfd   : > { %v220_v23 = vadd.f32 1e-06, %v219_v22 }
  0xff   : > { %555 = vrcp.f32 %v220_v23 }
 0x109   : > { %v556_v25 = vpop.eup %555 }
 0x10a   : > { %v223_v26 = vmul.f32 %v556_v25, %v222_v24 }
 0x10c   : > { %v224_v27 = vpack.c.bf16 %v223_v26, %v223_v26 }
 0x10e   : > { %481 = vmatmul.mubr.bf16.vlgmr.msra.gmra.mrb[0].mxu0 %v224_v27 }
 0x1e1   : > { %v330_v29 = vpop.f32.mrb[0].mxu0 }
 0x1e2   : > { %v331_v30 = vadd.f32 %v442_v28, %v330_v29  ;;  %v482_v31 = vpop.f32.mrb[1].mxu0 }
 0x1e3   : > { %v333_v32 = vpop.f32.mrb[2].mxu0 }
 0x1e4   : > { %v336_v33 = vadd.f32 %v331_v30, %v202_v0  ;;  %v483_v34 = vpop.f32.mrb[3].mxu0 }
 0x1e6   : > { %337 = vst [vmem:[%s200_s25] sm:$0xff] %v336_v33 }
 0x1e7   : > { %628 = shalt.err (!%p625_p7)
}
 0x1e8   : > { %s629_s29 = scalar_lea.hbm %s873_s9, 128  ;;  %s633_s22 = scalar_lea.hbm %s920_s3, 256 }
 0x1e9   : > { %p630_p9 = scmp.ne.s32.totalorder %s873_s9, %s629_s29  ;;  %p634_p0 = scmp.lt.u32.totalorder %s873_s9, %s920_s3 }
 0x1ea   : > { %p635_p11 = scmp.lt.u32.totalorder %s633_s22, %s629_s29  ;;  %p637_p4 = scmp.lt.u32.totalorder %s629_s29, %s873_s9 }
 0x1eb   : > { %p631_p2 = pnand %p630_p9, %p805_p12 }
 0x1ec   : > { %p636_p1 = por %p635_p11, %p634_p0 }
 0x1ed   : > { %p632_p5 = pneg %p631_p2 }
 0x1ee   : > { %p638_p6 = por %p637_p4, %p636_p1 }
 0x1f0   : > { %p639_p8 = pnand %p638_p6, %p632_p5 }
 0x1f2   : > { %642 = shalt.err (!%p639_p8)
}
 0x1f3   : > { %490 = dma.vmem_to_hbm [thread:$0]  (%p805_p12), %s875_s26, 128, %s873_s9, %s339_s16  }
 0x1f4 PF: > { %s364_s18 = sand.u32 1, %s673_s12   ;;  %p935_p10 = scmp.ne.s32.totalorder %s925_s19, 0 }
 0x1f5   : > { %p936_p13 = scmp.ge.s32.totalorder %s685_s15, 2  ;;  %s365_s20 = scalar_lea.sflag [#allocation4], %s364_s18 }
 0x1f7   : > { %p501_p3 = pnand %p936_p13, %p935_p10 }
 0x1f9   : > { %668 = dma.done.wait (!%p501_p3), %s365_s20, 128  }
 0x1fa   : > { %670 = vsyncadd (!%p501_p3), %s365_s20, 4294967168  ;;  %p17_p7 = scmp.ge.s32.totalorder %s770_s24, 4   ;;  %s937_s12 = smov %s677_s13 }
 0x1fb   : > { %s938_s13 = smov %s681_s14  ;;  %s939_s14 = smov %s801_s17 }
 0x1fc   : > { %s940_s15 = smov %s770_s24  ;;  %19 = sbr.rel (!%p17_p7) target bundleno = 6 (0x6), region = 81 }
 0x203   :  { %370 = vsyncpa [#allocation3], 1 }
 0x204   :  { %372 = vsyncpa [#allocation3 + $0x1], 1 }
 0x205   :  { %373 = vsyncpa [#allocation6], 1 }
 0x206   :  { %374 = vsyncpa [#allocation4], 1 }
 0x207   :  { %376 = vsyncpa [#allocation4 + $0x1], 1 }

</bundles_post_ra>
